<compile_context>
chip_gen: v6e
topology: v6e:2x2x1
jax: 0.10.0
libtpu: 0.0.40
codegen_flags: <defaults>
</compile_context>

<pallas_src>
import jax
import jax.numpy as jnp
from jax.experimental import pallas as pl
from jax.experimental.pallas import tpu as pltpu


def _round_up(x, m):
    return ((x + m - 1) // m) * m


def _vmem_capacity_bytes():
    """Best-effort physical-VMEM query; falls back to the v7x value (64 MiB)."""
    try:
        info = pltpu.get_tpu_info()
        for attr in ("vmem_capacity_bytes", "vmem_bytes", "vmem_size_bytes"):
            v = getattr(info, attr, None)
            if v:
                return int(v)
    except Exception:
        pass
    return 64 * 1024 * 1024


def attention_kernel(z_ref, w1_ref, b1_ref, w2_ref, ebc_ref, gsum_ref,
                     out_ref, beta_ref):
    """One batch tile.

    z_ref   : (TB, M*D)   lane-dense modality-flattened inputs (f32 or bf16)
    w1_ref  : (M*D, M*H)  block-diagonal first-Linear weight  = kron(I_M, w1)
    b1_ref  : (1, M*H)    first-Linear bias tiled M times
    w2_ref  : (M*H, M)    block-diagonal second-Linear weight = kron(I_M, w2)
    ebc_ref : (M, M*D)    beta -> per-feature broadcast matrix = kron(I_M, 1_{1xD})
    gsum_ref: (M*D, D)    per-modality group-sum matrix        = kron(1_{Mx1}, I_D)
    """
    # ---- Linear(in, hidden) + Tanh: all M modalities in one MXU matmul ----
    # z is already lane-dense (no (TB,M,D)->(TB*M,D) sublane relayout) and the
    # block-diagonal weight makes this a full K = M*D, N = M*H wide matmul.
    h = jnp.dot(z_ref[...], w1_ref[...], preferred_element_type=jnp.float32)
    h = jnp.tanh(h + b1_ref[...])                       # (TB, M*H) f32, tanh on EUP

    # ---- Linear(hidden, 1, bias=False) per modality -> logits -------------
    logits = jnp.dot(h, w2_ref[...], preferred_element_type=jnp.float32)   # (TB, M)

    # ---- softmax over the modality axis (dim=1 in PyTorch) ----------------
    m = jnp.max(logits, axis=-1, keepdims=True)
    e = jnp.exp(logits - m)
    denom = jnp.sum(e, axis=-1, keepdims=True)
    beta = e * pl.reciprocal(denom, approx=False)       # exact: rows sum to 1

    # ---- attention-weighted sum over modalities ----------------------------
    # beta -> (TB, M*D) broadcast and the per-modality group-sum are both tiny
    # matmuls, so there are no sub-lane-tile slices / relayouts in the body.
    beta_bc = jnp.dot(beta, ebc_ref[...], preferred_element_type=jnp.float32)     # (TB, M*D)
    zf = z_ref[...].astype(jnp.float32)                 # re-read near use: short live range
    fused = jnp.dot(beta_bc * zf, gsum_ref[...],
                    preferred_element_type=jnp.float32)                            # (TB, D)

    out_ref[...] = fused.astype(out_ref.dtype)
    # TODO(synk): fused (TB, D<128) and beta (TB, M<128) stores lower to masked
    # vst.msk partial stores. beta bytes are negligible; if production D stays
    # < 128, fold 128//D batch rows per output row in the wrapper to make the
    # fused store lane-dense.
    beta_ref[...] = beta.astype(beta_ref.dtype)


def attention_forward(z, w1, b1, w2, *, bf16_stream=False, block_b=None):
    """z: (B, M, D) float32. Returns (fused (B, D), beta (B, M, 1)).

    bf16_stream=True streams z (and the first-Linear weight) from HBM as
    bfloat16, halving the dominant HBM stream on this bandwidth-bound kernel.
    Off by default to keep exact f32 parity with the PyTorch module.
    """
    B, M, D = z.shape
    H = w1.shape[1]
    MD, MH = M * D, M * H

    in_dtype = jnp.bfloat16 if bf16_stream else jnp.float32

    # ---- resident constants (constant index_map -> DMA'd once) ------------
    eye_m = jnp.eye(M, dtype=jnp.float32)
    w1_bd = jnp.kron(eye_m, w1.astype(jnp.float32)).astype(in_dtype)        # (MD, MH)
    b1_t = jnp.tile(b1.reshape(1, H).astype(jnp.float32), (1, M))           # (1, MH)
    w2_bd = jnp.kron(eye_m, w2.reshape(H, 1).astype(jnp.float32))           # (MH, M)
    e_bc = jnp.kron(eye_m, jnp.ones((1, D), jnp.float32))                   # (M, MD)
    g_sum = jnp.kron(jnp.ones((M, 1), jnp.float32),
                     jnp.eye(D, dtype=jnp.float32))                         # (MD, D)

    # ---- z layout: (B, M, D) -> (B, M*D), contiguous reshape (free) -------
    # bf16 cast (if any) happens once here instead of per grid step.
    z2d = z.reshape(B, MD).astype(in_dtype)

    # ---- generation-aware VMEM budget & batch-tile sizing ------------------
    vmem_cap = _vmem_capacity_bytes()
    if vmem_cap >= 96 * 1024 * 1024:           # v5e / v6e: 128 MiB physical VMEM
        vmem_limit = 96 * 1024 * 1024
    else:                                       # v7x: 64 MiB physical per TC
        vmem_limit = 48 * 1024 * 1024
    budget = int(vmem_limit * 0.55)             # headroom for compiler scratch

    z_elt = 2 if bf16_stream else 4
    z_row = MD * z_elt                          # streamed z bytes per batch row
    # double-buffered z + double-buffered outputs + ~3 f32 body temporaries
    work_row = 2 * z_row + 2 * (D * 4 + M * 4) + 3 * max(MD, MH) * 4

    tb_cap = max(8, (budget // work_row) // 8 * 8)
    TB = min(tb_cap, _round_up(B, 8))
    # Keep several pipelined grid steps (feeds both v7x TensorCores and hides
    # DMA), but never shrink the z tile below ~2 MiB just to add steps.
    min_rows = max(8, ((2 * 1024 * 1024) // max(z_row, 1)) // 8 * 8)
    target_steps = 8
    if _round_up(B, 8) >= target_steps * min_rows:
        TB = min(TB, max(min_rows,
                         _round_up((B + target_steps - 1) // target_steps, 8)))
    if block_b is not None:
        TB = min(TB, max(8, (block_b // 8) * 8))
    TB = max(8, (TB // 8) * 8)

    # Pad batch so the grid tiles evenly (padded rows are independent and
    # sliced off afterwards; zero rows produce a benign uniform softmax).
    Bp = _round_up(B, TB)
    if Bp != B:
        z2d = jnp.pad(z2d, ((0, Bp - B), (0, 0)))

    grid = (Bp // TB,)

    fused, beta = pl.pallas_call(
        attention_kernel,
        grid=grid,
        in_specs=[
            pl.BlockSpec((TB, MD), lambda i: (i, 0)),   # streamed z tiles
            pl.BlockSpec((MD, MH), lambda i: (0, 0)),   # resident constants:
            pl.BlockSpec((1, MH), lambda i: (0, 0)),    #   DMA'd once, reused
            pl.BlockSpec((MH, M), lambda i: (0, 0)),
            pl.BlockSpec((M, MD), lambda i: (0, 0)),
            pl.BlockSpec((MD, D), lambda i: (0, 0)),
        ],
        out_specs=(
            pl.BlockSpec((TB, D), lambda i: (i, 0)),
            pl.BlockSpec((TB, M), lambda i: (i, 0)),
        ),
        out_shape=(
            jax.ShapeDtypeStruct((Bp, D), jnp.float32),
            jax.ShapeDtypeStruct((Bp, M), jnp.float32),
        ),
        compiler_params=pltpu.CompilerParams(
            dimension_semantics=("parallel",),  # shard batch tiles across TCs (v7x)
            vmem_limit_bytes=vmem_limit,
        ),
    )(z2d, w1_bd, b1_t, w2_bd, e_bc, g_sum)

    fused = fused[:B]
    beta = beta[:B]
    # PyTorch returns beta with shape (B, M, 1) (output of Linear(hidden, 1)).
    return fused, beta.reshape(B, M, 1)


def reference_forward(z, w1, b1, w2):
    """Pure-JAX reference matching the PyTorch semantics exactly."""
    hp = jax.lax.Precision.HIGHEST
    w = jnp.einsum('bmd,dh->bmh', z, w1, precision=hp) + b1   # Linear(in_size, hidden)
    w = jnp.tanh(w)
    w = jnp.einsum('bmh,ho->bmo', w, w2, precision=hp)        # Linear(hidden, 1, bias=False)
    beta = jax.nn.softmax(w, axis=1)                          # softmax over dim=1
    return (beta * z).sum(axis=1), beta


if __name__ == "__main__":
    # Small shapes consistent with the module: batch=2, num_views=4,
    # in_size=32, hidden_size=32 (module default is 128; kept small here).
    B, M, D, H = 2, 4, 32, 32

    key = jax.random.PRNGKey(0)
    kz, k1, k2, k3 = jax.random.split(key, 4)

    z = jax.random.normal(kz, (B, M, D), dtype=jnp.float32)
    # nn.Linear(in_size, hidden) / nn.Linear(hidden, 1, bias=False) params,
    # stored as (in, out) for row-major matmul.
    w1 = jax.random.normal(k1, (D, H), dtype=jnp.float32) * 0.1
    b1 = jax.random.normal(k2, (H,), dtype=jnp.float32) * 0.1
    w2 = jax.random.normal(k3, (H, 1), dtype=jnp.float32) * 0.1

    fused, beta = attention_forward(z, w1, b1, w2)
    jax.block_until_ready((fused, beta))

    fused_ref, beta_ref = reference_forward(z, w1, b1, w2)
    assert fused.shape == (B, D) and beta.shape == (B, M, 1)
    # Exact reciprocal + f32 matmuls: tolerances back at the 1e-4 level.
    assert jnp.allclose(fused, fused_ref, atol=1e-4, rtol=1e-4)
    assert jnp.allclose(beta, beta_ref, atol=1e-4, rtol=1e-4)

    print("KERNEL_OK")
</pallas_src>

<mosaic_0001>
module attributes {stable_mosaic.version = 11 : i64} {
  func.func @attention_kernel(%arg0: i32, %arg1: memref<8x128xf32, #tpu.memory_space<vmem>>, %arg2: memref<128x128xf32, #tpu.memory_space<vmem>>, %arg3: memref<1x128xf32, #tpu.memory_space<vmem>>, %arg4: memref<128x4xf32, #tpu.memory_space<vmem>>, %arg5: memref<4x128xf32, #tpu.memory_space<vmem>>, %arg6: memref<128x32xf32, #tpu.memory_space<vmem>>, %arg7: memref<8x32xf32, #tpu.memory_space<vmem>>, %arg8: memref<8x4xf32, #tpu.memory_space<vmem>>) attributes {dimension_semantics = [#tpu.dimension_semantics<parallel>], iteration_bounds = array<i64: 1>, scalar_prefetch = 0 : i64, scratch_operands = 0 : i64, tpu.core_type = #tpu.core_type<tc>, window_params = [{transform_indices = @transform_0, window_bounds = array<i64: 8, 128>}, {pipeline_mode = #tpu.pipeline_mode<synchronous>, transform_indices = @transform_1, window_bounds = array<i64: 128, 128>}, {pipeline_mode = #tpu.pipeline_mode<synchronous>, transform_indices = @transform_2, window_bounds = array<i64: 1, 128>}, {pipeline_mode = #tpu.pipeline_mode<synchronous>, transform_indices = @transform_3, window_bounds = array<i64: 128, 4>}, {pipeline_mode = #tpu.pipeline_mode<synchronous>, transform_indices = @transform_4, window_bounds = array<i64: 4, 128>}, {pipeline_mode = #tpu.pipeline_mode<synchronous>, transform_indices = @transform_5, window_bounds = array<i64: 128, 32>}, {transform_indices = @transform_6, window_bounds = array<i64: 8, 32>}, {transform_indices = @transform_7, window_bounds = array<i64: 8, 4>}]} {
    %c0 = arith.constant 0 : index
    %c0_0 = arith.constant 0 : index
    %0 = vector.load %arg1[%c0, %c0_0] : memref<8x128xf32, #tpu.memory_space<vmem>>, vector<8x128xf32>
    %c0_1 = arith.constant 0 : index
    %c0_2 = arith.constant 0 : index
    %1 = vector.load %arg2[%c0_1, %c0_2] : memref<128x128xf32, #tpu.memory_space<vmem>>, vector<128x128xf32>
    %cst = arith.constant dense<0.000000e+00> : vector<8x128xf32>
    %2 = tpu.matmul %0, %1, %cst {dimension_numbers = #tpu.dot_dimension_numbers<[1], [0], [0], [1], [0, 0, 1, 1], [], []>} : vector<8x128xf32>, vector<128x128xf32>, vector<8x128xf32> -> vector<8x128xf32>
    %c0_3 = arith.constant 0 : index
    %c0_4 = arith.constant 0 : index
    %3 = vector.load %arg3[%c0_3, %c0_4] : memref<1x128xf32, #tpu.memory_space<vmem>>, vector<1x128xf32>
    %4 = vector.broadcast %3 : vector<1x128xf32> to vector<8x128xf32>
    %5 = arith.addf %2, %4 : vector<8x128xf32>
    %6 = math.tanh %5 : vector<8x128xf32>
    %c0_5 = arith.constant 0 : index
    %c0_6 = arith.constant 0 : index
    %7 = vector.load %arg4[%c0_5, %c0_6] : memref<128x4xf32, #tpu.memory_space<vmem>>, vector<128x4xf32>
    %cst_7 = arith.constant dense<0.000000e+00> : vector<8x4xf32>
    %8 = tpu.matmul %6, %7, %cst_7 {dimension_numbers = #tpu.dot_dimension_numbers<[1], [0], [0], [1], [0, 0, 1, 1], [], []>} : vector<8x128xf32>, vector<128x4xf32>, vector<8x4xf32> -> vector<8x4xf32>
    %cst_8 = arith.constant dense<0xFF800000> : vector<8xf32>
    %9 = vector.multi_reduction <maximumf>, %8, %cst_8 [1] : vector<8x4xf32> to vector<8xf32>
    %10 = vector.shape_cast %9 : vector<8xf32> to vector<8x1xf32>
    %11 = vector.broadcast %10 : vector<8x1xf32> to vector<8x4xf32>
    %12 = arith.subf %8, %11 : vector<8x4xf32>
    %13 = math.exp %12 : vector<8x4xf32>
    %cst_9 = arith.constant dense<0.000000e+00> : vector<8xf32>
    %14 = vector.multi_reduction <add>, %13, %cst_9 [1] : vector<8x4xf32> to vector<8xf32>
    %15 = vector.shape_cast %14 : vector<8xf32> to vector<8x1xf32>
    %16 = tpu.reciprocal %15 : vector<8x1xf32> -> vector<8x1xf32>
    %17 = vector.broadcast %16 : vector<8x1xf32> to vector<8x4xf32>
    %18 = arith.mulf %13, %17 : vector<8x4xf32>
    %c0_10 = arith.constant 0 : index
    %c0_11 = arith.constant 0 : index
    %19 = vector.load %arg5[%c0_10, %c0_11] : memref<4x128xf32, #tpu.memory_space<vmem>>, vector<4x128xf32>
    %cst_12 = arith.constant dense<0.000000e+00> : vector<8x128xf32>
    %20 = tpu.matmul %18, %19, %cst_12 {dimension_numbers = #tpu.dot_dimension_numbers<[1], [0], [0], [1], [0, 0, 1, 1], [], []>} : vector<8x4xf32>, vector<4x128xf32>, vector<8x128xf32> -> vector<8x128xf32>
    %c0_13 = arith.constant 0 : index
    %c0_14 = arith.constant 0 : index
    %21 = vector.load %arg1[%c0_13, %c0_14] : memref<8x128xf32, #tpu.memory_space<vmem>>, vector<8x128xf32>
    %22 = arith.mulf %20, %21 : vector<8x128xf32>
    %c0_15 = arith.constant 0 : index
    %c0_16 = arith.constant 0 : index
    %23 = vector.load %arg6[%c0_15, %c0_16] : memref<128x32xf32, #tpu.memory_space<vmem>>, vector<128x32xf32>
    %cst_17 = arith.constant dense<0.000000e+00> : vector<8x32xf32>
    %24 = tpu.matmul %22, %23, %cst_17 {dimension_numbers = #tpu.dot_dimension_numbers<[1], [0], [0], [1], [0, 0, 1, 1], [], []>} : vector<8x128xf32>, vector<128x32xf32>, vector<8x32xf32> -> vector<8x32xf32>
    %c0_18 = arith.constant 0 : index
    %c0_19 = arith.constant 0 : index
    %25 = vector.load %arg7[%c0_18, %c0_19] : memref<8x32xf32, #tpu.memory_space<vmem>>, vector<8x32xf32>
    tpu.vector_store %arg7[%c0_18, %c0_19], %24 {strides = array<i32>} : memref<8x32xf32, #tpu.memory_space<vmem>>, vector<8x32xf32>,
    %c0_20 = arith.constant 0 : index
    %c0_21 = arith.constant 0 : index
    %26 = vector.load %arg8[%c0_20, %c0_21] : memref<8x4xf32, #tpu.memory_space<vmem>>, vector<8x4xf32>
    tpu.vector_store %arg8[%c0_20, %c0_21], %18 {strides = array<i32>} : memref<8x4xf32, #tpu.memory_space<vmem>>, vector<8x4xf32>,
    return
  }
  func.func @transform_0(%arg0: i32) -> (i32, i32) {
    %c0_i32 = arith.constant 0 : i32
    %c0_i32_0 = arith.constant 0 : i32
    return %arg0, %c0_i32 : i32, i32
  }
  func.func @transform_1(%arg0: i32) -> (i32, i32) {
    %c0_i32 = arith.constant 0 : i32
    %c0_i32_0 = arith.constant 0 : i32
    %c0_i32_1 = arith.constant 0 : i32
    return %c0_i32, %c0_i32_0 : i32, i32
  }
  func.func @transform_2(%arg0: i32) -> (i32, i32) {
    %c0_i32 = arith.constant 0 : i32
    %c0_i32_0 = arith.constant 0 : i32
    %c0_i32_1 = arith.constant 0 : i32
    return %c0_i32, %c0_i32_0 : i32, i32
  }
  func.func @transform_3(%arg0: i32) -> (i32, i32) {
    %c0_i32 = arith.constant 0 : i32
    %c0_i32_0 = arith.constant 0 : i32
    %c0_i32_1 = arith.constant 0 : i32
    return %c0_i32, %c0_i32_0 : i32, i32
  }
  func.func @transform_4(%arg0: i32) -> (i32, i32) {
    %c0_i32 = arith.constant 0 : i32
    %c0_i32_0 = arith.constant 0 : i32
    %c0_i32_1 = arith.constant 0 : i32
    return %c0_i32, %c0_i32_0 : i32, i32
  }
  func.func @transform_5(%arg0: i32) -> (i32, i32) {
    %c0_i32 = arith.constant 0 : i32
    %c0_i32_0 = arith.constant 0 : i32
    %c0_i32_1 = arith.constant 0 : i32
    return %c0_i32, %c0_i32_0 : i32, i32
  }
  func.func @transform_6(%arg0: i32) -> (i32, i32) {
    %c0_i32 = arith.constant 0 : i32
    %c0_i32_0 = arith.constant 0 : i32
    return %arg0, %c0_i32 : i32, i32
  }
  func.func @transform_7(%arg0: i32) -> (i32, i32) {
    %c0_i32 = arith.constant 0 : i32
    %c0_i32_0 = arith.constant 0 : i32
    return %arg0, %c0_i32 : i32, i32
  }
}

</mosaic_0001>

<bundles_post_ra>
// kernel: tpu_custom_call.1
= control target key start
LH: loop header
LB: loop body
LE: loop exit
PB: predicated region body
PF: predicated region fallthrough
CT: control target
= control target key end

     0   :  { %v602_v1 = vmov 0.0   ;;  %vm603_vm0 = vmmov 0   ;;  %s869_s0 = inlined_call_operand.vmem [shape: f32[8,128], index: 0, kind: input, shape index: {}]   ;;  %s870_s1 = inlined_call_operand.vmem [shape: f32[128,128], index: 1, kind: input, shape index: {}]   ;;  %s871_s2 = inlined_call_operand.vmem [shape: f32[1,128], index: 2, kind: input, shape index: {}]   ;;  %s872_s3 = inlined_call_operand.vmem [shape: f32[128,4], index: 3, kind: input, shape index: {}]   ;;  %s873_s4 = inlined_call_operand.vmem [shape: f32[4,128], index: 4, kind: input, shape index: {}]   ;;  %s874_s5 = inlined_call_operand.vmem [shape: f32[128,32], index: 5, kind: input, shape index: {}]   ;;  %s875_s6 = inlined_call_operand.hbm [shape: f32[8,32], index: 6, kind: output, shape index: {0}]   ;;  %s876_s7 = inlined_call_operand.vmem [shape: f32[8,4], index: 7, kind: output, shape index: {1}]  }
   0x1   :  { %v42_v0 = vld [vmem:[%s870_s1 + $0x78] sm:$0xff]  ;;  %461 = vmatprep.subr.mxu0 %v602_v1  ;;  %v41_v2 = vld [vmem:[%s870_s1 + $0x70] sm:$0xff]  ;;  %493 = vmatprep.mubr.msk.f32.mxu0 %vm603_vm0, %v602_v1  ;;  %v40_v3 = vld [vmem:[%s870_s1 + $0x68] sm:$0xff] }
   0x2   :  { %462 = vmatpush3.msra.mxu0 %v42_v0  ;;  %496 = vmatprep.subr.mxu1 %v602_v1  ;;  %v39_v4 = vld [vmem:[%s870_s1 + $0x60] sm:$0xff]  ;;  %v136_v5 = vld [vmem:[%s872_s3 + $0x78] sm:$0xff]  ;;  %v135_v6 = vld [vmem:[%s872_s3 + $0x70] sm:$0xff] }
   0x3   :  { %463 = vmatprep.subr.mxu0 %v602_v1  ;;  %528 = vmatprep.mubr.msk.f32.mxu1 %vm603_vm0, %v602_v1  ;;  %v38_v7 = vld [vmem:[%s870_s1 + $0x58] sm:$0xff]  ;;  %v134_v8 = vld [vmem:[%s872_s3 + $0x68] sm:$0xff] }
   0x4   :  { %464 = vmatpush3.msra.mxu0 %v41_v2  ;;  %497 = vmatpush3.msra.mxu1 %v136_v5 }
   0x5   :  { %465 = vmatprep.subr.mxu0 %v602_v1  ;;  %498 = vmatprep.subr.mxu1 %v602_v1 }
   0x6   :  { %466 = vmatpush3.msra.mxu0 %v40_v3  ;;  %499 = vmatpush3.msra.mxu1 %v135_v6 }
   0x7   :  { %467 = vmatprep.subr.mxu0 %v602_v1 }
   0x8   :  { %468 = vmatpush3.msra.mxu0 %v39_v4 }
   0x9   :  { %13 = vsyncpa [#allocation3], 0  ;;  %469 = vmatprep.subr.mxu0 %v602_v1  ;;  %v37_v9 = vld [vmem:[%s870_s1 + $0x50] sm:$0xff]  ;;  %500 = vmatprep.subr.mxu1 %v602_v1  ;;  %v133_v10 = vld [vmem:[%s872_s3 + $0x60] sm:$0xff]  ;;  %vm207_vm1 = vcmask 31744   ;;  %vm223_vm2 = vcmask 1043456  }
   0xa   :  { %470 = vmatpush3.msra.mxu0 %v38_v7  ;;  %501 = vmatpush3.msra.mxu1 %v134_v8  ;;  %v36_v11 = vld [vmem:[%s870_s1 + $0x48] sm:$0xff]  ;;  %v132_v12 = vld [vmem:[%s872_s3 + $0x58] sm:$0xff]  ;;  %v35_v13 = vld [vmem:[%s870_s1 + $0x40] sm:$0xff]  ;;  %vm384_vm3 = vcmask 261120  }
   0xb   :  { %471 = vmatprep.subr.mxu0 %v602_v1  ;;  %502 = vmatprep.subr.mxu1 %v602_v1  ;;  %v131_v14 = vld [vmem:[%s872_s3 + $0x50] sm:$0xff]  ;;  %v34_v15 = vld [vmem:[%s870_s1 + $0x38] sm:$0xff]  ;;  %v130_v16 = vld [vmem:[%s872_s3 + $0x48] sm:$0xff] }
   0xc   :  { %472 = vmatpush3.msra.mxu0 %v37_v9  ;;  %503 = vmatpush3.msra.mxu1 %v133_v10  ;;  %v33_v17 = vld [vmem:[%s870_s1 + $0x30] sm:$0xff]  ;;  %v32_v18 = vld [vmem:[%s870_s1 + $0x28] sm:$0xff]  ;;  %v31_v19 = vld [vmem:[%s870_s1 + $0x20] sm:$0xff] }
   0xd   :  { %473 = vmatprep.subr.mxu0 %v602_v1  ;;  %504 = vmatprep.subr.mxu1 %v602_v1  ;;  %v30_v20 = vld [vmem:[%s870_s1 + $0x18] sm:$0xff]  ;;  %v29_v21 = vld [vmem:[%s870_s1 + $0x10] sm:$0xff]  ;;  %v28_v22 = vld [vmem:[%s870_s1 + $0x8] sm:$0xff] }
   0xe   :  { %474 = vmatpush3.msra.mxu0 %v36_v11  ;;  %505 = vmatpush3.msra.mxu1 %v132_v12  ;;  %v27_v23 = vld [vmem:[%s870_s1] sm:$0xff]  ;;  %v128_v26 = vld [vmem:[%s872_s3 + $0x38] sm:$0xff]  ;;  %v127_v27 = vld [vmem:[%s872_s3 + $0x30] sm:$0xff] }
   0xf   :  { %475 = vmatprep.subr.mxu0 %v602_v1  ;;  %506 = vmatprep.subr.mxu1 %v602_v1  ;;  %v744_v24 = vld [vmem:[%s869_s0] sm:$0xff]  ;;  %v126_v28 = vld [vmem:[%s872_s3 + $0x28] sm:$0xff]  ;;  %v124_v30 = vld [vmem:[%s872_s3 + $0x18] sm:$0xff] }
  0x10   :  { %476 = vmatpush3.msra.mxu0 %v35_v13  ;;  %507 = vmatpush3.msra.mxu1 %v131_v14  ;;  %v129_v25 = vld [vmem:[%s872_s3 + $0x40] sm:$0xff]  ;;  %v123_v31 = vld [vmem:[%s872_s3 + $0x10] sm:$0xff]  ;;  %v122_v32 = vld [vmem:[%s872_s3 + $0x8] sm:$0xff] }
  0x11   :  { %477 = vmatprep.subr.mxu0 %v602_v1  ;;  %508 = vmatprep.subr.mxu1 %v602_v1  ;;  %v125_v29 = vld [vmem:[%s872_s3 + $0x20] sm:$0xff]  ;;  %v313_v48 = vld [vmem:[%s874_s5 + $0x78] sm:$0xff]  ;;  %v312_v49 = vld [vmem:[%s874_s5 + $0x70] sm:$0xff] }
  0x12   :  { %478 = vmatpush3.msra.mxu0 %v34_v15  ;;  %509 = vmatpush3.msra.mxu1 %v130_v16  ;;  %v121_v33 = vld [vmem:[%s872_s3] sm:$0xff]  ;;  %v311_v50 = vld [vmem:[%s874_s5 + $0x68] sm:$0xff]  ;;  %v309_v52 = vld [vmem:[%s874_s5 + $0x58] sm:$0xff] }
  0x13   :  { %479 = vmatprep.subr.mxu0 %v602_v1  ;;  %510 = vmatprep.subr.mxu1 %v602_v1  ;;  %v405_v34 = vld [vmem:[%s871_s2] ss:$0 sm:$0xff]  ;;  %v308_v53 = vld [vmem:[%s874_s5 + $0x50] sm:$0xff]  ;;  %v307_v54 = vld [vmem:[%s874_s5 + $0x48] sm:$0xff] }
  0x14   :  { %480 = vmatpush3.msra.mxu0 %v33_v17  ;;  %511 = vmatpush3.msra.mxu1 %v129_v25  ;;  %v219_v47 = vld [vmem:[%s873_s4] sm:$0xf]  ;;  %v305_v56 = vld [vmem:[%s874_s5 + $0x38] sm:$0xff]  ;;  %v304_v57 = vld [vmem:[%s874_s5 + $0x30] sm:$0xff]  ;;  %s604_s4 = smov [#allocation2]  }
  0x15   :  { %481 = vmatprep.subr.mxu0 %v602_v1  ;;  %512 = vmatprep.subr.mxu1 %v602_v1  ;;  %v310_v51 = vld [vmem:[%s874_s5 + $0x60] sm:$0xff]  ;;  %v303_v58 = vld [vmem:[%s874_s5 + $0x28] sm:$0xff]  ;;  %v301_v60 = vld [vmem:[%s874_s5 + $0x18] sm:$0xff]  ;;  %s393_s27 = sshll.u32 %s604_s4, 4  ;;  %s394_s27 = int_to_ptr.vmem [resolvable:$true] %s393_s27 }
  0x16   :  { %482 = vmatpush3.msra.mxu0 %v32_v18  ;;  %513 = vmatpush3.msra.mxu1 %v128_v26  ;;  %v306_v55 = vld [vmem:[%s874_s5 + $0x40] sm:$0xff]  ;;  %v300_v61 = vld [vmem:[%s874_s5 + $0x10] sm:$0xff]  ;;  %v299_v2 = vld [vmem:[%s874_s5 + $0x8] sm:$0xff]  ;;  %p585_p1 = scmp.lt.s32.totalorder %s394_s27, %s394_s27 }
  0x17   :  { %483 = vmatprep.subr.mxu0 %v602_v1  ;;  %514 = vmatprep.subr.mxu1 %v602_v1  ;;  %v302_v59 = vld [vmem:[%s874_s5 + $0x20] sm:$0xff] }
  0x18   :  { %484 = vmatpush3.msra.mxu0 %v31_v19  ;;  %515 = vmatpush3.msra.mxu1 %v127_v27  ;;  %v298_v3 = vld [vmem:[%s874_s5] sm:$0xff] }
  0x19   :  { %485 = vmatprep.subr.mxu0 %v602_v1  ;;  %516 = vmatprep.subr.mxu1 %v602_v1 }
  0x1a   :  { %486 = vmatpush3.msra.mxu0 %v30_v20  ;;  %517 = vmatpush3.msra.mxu1 %v126_v28 }
  0x1b   :  { %487 = vmatprep.subr.mxu0 %v602_v1  ;;  %518 = vmatprep.subr.mxu1 %v602_v1 }
  0x1c   :  { %488 = vmatpush3.msra.mxu0 %v29_v21  ;;  %519 = vmatpush3.msra.mxu1 %v125_v29 }
  0x1d   :  { %489 = vmatprep.subr.mxu0 %v602_v1  ;;  %520 = vmatprep.subr.mxu1 %v602_v1 }
  0x1e   :  { %490 = vmatpush3.msra.mxu0 %v28_v22  ;;  %521 = vmatpush3.msra.mxu1 %v124_v30 }
  0x1f   :  { %491 = vmatprep.subr.mxu0 %v602_v1  ;;  %522 = vmatprep.subr.mxu1 %v602_v1 }
  0x20   :  { %492 = vmatpush3.msra.mxu0 %v27_v23  ;;  %523 = vmatpush3.msra.mxu1 %v123_v31 }
  0x21   :  { %494 = vmatmul.mubr.f32.vlgmr.msra.gmra.mxu0 %v744_v24  ;;  %531 = vmatprep.subr.mxu0 %v602_v1 }
  0x22   :  { %533 = vmatprep.mubr.msk.f32.mxu0 %vm603_vm0, %v602_v1  ;;  %524 = vmatprep.subr.mxu1 %v602_v1 }
  0x23   :  { %525 = vmatpush3.msra.mxu1 %v122_v32  ;;  %532 = vmatpush3.msk.msra.mxu0 %vm223_vm2, %v219_v47 }
  0x24   :  { %526 = vmatprep.subr.mxu1 %v602_v1 }
  0x25   :  { %527 = vmatpush3.msra.mxu1 %v121_v33 }
  0x26   :  { %536 = vmatprep.subr.mxu1 %v602_v1 }
  0xe1   :  { %v116_v35 = vpop.f32.mrf.mxu0 }
  0xe2   :  { %v117_v36 = vadd.f32 %v405_v34, %v116_v35 }
  0xe3   :  { %v495_v37 = vpop.f32.mrf.mxu0 }
  0xe4   :  { %574 = vtanh.f32 %v117_v36 }
  0xf1   :  { %v575_v38 = vpop.eup %574 }
  0xf2   :  { %529 = vmatmul.mubr.f32.vlgmr.msra.gmra.mxu1 %v575_v38 }
  0xf3   :  { %568 = vmatprep.mubr.msk.f32.mxu1 %vm603_vm0, %v602_v1  ;;  %537 = vmatpush3.msra.mxu1 %v313_v48 }
  0xf4   :  { %538 = vmatprep.subr.mxu1 %v602_v1 }
  0xf5   :  { %539 = vmatpush3.msra.mxu1 %v312_v49 }
  0xf6   :  { %540 = vmatprep.subr.mxu1 %v602_v1 }
  0xf7   :  { %541 = vmatpush3.msra.mxu1 %v311_v50 }
  0xf8   :  { %542 = vmatprep.subr.mxu1 %v602_v1 }
  0xf9   :  { %543 = vmatpush3.msra.mxu1 %v310_v51 }
  0xfa   :  { %544 = vmatprep.subr.mxu1 %v602_v1 }
  0xfb   :  { %545 = vmatpush3.msra.mxu1 %v309_v52 }
  0xfc   :  { %546 = vmatprep.subr.mxu1 %v602_v1 }
  0xfd   :  { %547 = vmatpush3.msra.mxu1 %v308_v53 }
  0xfe   :  { %548 = vmatprep.subr.mxu1 %v602_v1 }
  0xff   :  { %549 = vmatpush3.msra.mxu1 %v307_v54 }
 0x100   :  { %550 = vmatprep.subr.mxu1 %v602_v1 }
 0x101   :  { %551 = vmatpush3.msra.mxu1 %v306_v55 }
 0x102   :  { %552 = vmatprep.subr.mxu1 %v602_v1 }
 0x103   :  { %553 = vmatpush3.msra.mxu1 %v305_v56 }
 0x104   :  { %554 = vmatprep.subr.mxu1 %v602_v1 }
 0x105   :  { %555 = vmatpush3.msra.mxu1 %v304_v57 }
 0x106   :  { %556 = vmatprep.subr.mxu1 %v602_v1 }
 0x107   :  { %557 = vmatpush3.msra.mxu1 %v303_v58 }
 0x108   :  { %558 = vmatprep.subr.mxu1 %v602_v1 }
 0x109   :  { %559 = vmatpush3.msra.mxu1 %v302_v59 }
 0x10a   :  { %560 = vmatprep.subr.mxu1 %v602_v1 }
 0x10b   :  { %561 = vmatpush3.msra.mxu1 %v301_v60 }
 0x10c   :  { %562 = vmatprep.subr.mxu1 %v602_v1 }
 0x10d   :  { %563 = vmatpush3.msra.mxu1 %v300_v61 }
 0x10e   :  { %564 = vmatprep.subr.mxu1 %v602_v1 }
 0x10f   :  { %565 = vmatpush3.msra.mxu1 %v299_v2 }
 0x110   :  { %566 = vmatprep.subr.mxu1 %v602_v1 }
 0x111   :  { %567 = vmatpush3.msra.mxu1 %v298_v3 }
 0x1b2   :  { %v203_v39 = vpop.f32.mrf.mxu1 }
 0x1b3   :  { %v208_v40 = vsel %vm207_vm1, %v203_v39, -inf }
 0x1b4   :  { %209 = vmax.xlane.f32.xlu0 %v208_v40  ;;  %v530_v41 = vpop.f32.mrf.mxu1 }
 0x23d   :  { %v210_v42 = vpop.xlane.xlu0 %209 }
 0x23e   :  { %v211_v43 = vsub.f32 %v203_v39, %v210_v42 }
 0x240   :  { %v212_v44 = vmul.f32 1.442695, %v211_v43 }
 0x242   :  { %576 = vpow2.f32 %v212_v44 }
 0x24f   :  { %v577_v45 = vpop.eup %576 }
 0x250   :  { %v214_v46 = vsel %vm207_vm1, %v577_v45, 0.0 }
 0x251   :  { %215 = vadd.xlane.f32.xlu0 %v214_v46 }
 0x2da   :  { %v216_v62 = vpop.xlane.xlu0 %215 }
 0x2db   :  { %578 = vrcp.f32 %v216_v62 }
 0x2e8   :  { %v579_v63 = vpop.eup %578 }
 0x2e9   :  { %v218_v0 = vmul.f32 %v579_v63, %v577_v45 }
 0x2eb   :  { %534 = vmatmul.mubr.msk.f32.vlgmr.msra.gmra.mxu0 %vm207_vm1, %v218_v0  ;;  %386 = vst.msk [vmem:[%s876_s7] sm:$0xff] %vm207_vm1, %v218_v0  ;;  %s580_s7 = scalar_lea.vmem %s394_s27, 128 }
 0x2ec   :  { %p581_p0 = scmp.ne.s32.totalorder %s394_s27, %s580_s7  ;;  %p586_p2 = scmp.lt.s32.totalorder %s580_s7, %s580_s7 }
 0x2ee   :  { %p587_p3 = por %p586_p2, %p585_p1 }
 0x2f0   :  { %p588_p4 = pnand %p587_p3, %p581_p0 }
 0x3ab   :  { %v293_v4 = vpop.f32.mrf.mxu0 }
 0x3ac   :  { %v297_v5 = vmul.f32 %v293_v4, %v744_v24 }
 0x3ad   :  { %v535_v6 = vpop.f32.mrf.mxu0 }
 0x3ae   :  { %569 = vmatmul.mubr.f32.vlgmr.msra.gmra.mxu1 %v297_v5 }
 0x46e   :  { %v380_v7 = vpop.f32.mrf.mxu1 }
 0x46f   :  { %385 = vst.msk [vmem:[#allocation2] sm:$0xff] %vm384_vm3, %v380_v7 }
 0x470   :  { %v570_v8 = vpop.f32.mrf.mxu1 }
 0x471   :  { %591 = shalt.err (!%p588_p4)
}
 0x472   :  { %396 = dma.vmem_to_hbm [thread:$0]  %s394_s27, 128, %s875_s6, [#allocation3]  }
 0x473   :  { %600 = dma.done.wait [#allocation3], 128  }
 0x474   :  { %601 = vsyncadd [#allocation3], 4294967168 }
 0x475   :  { %404 = vsyncpa [#allocation3], 1 }

</bundles_post_ra>
